<compile_context>
chip_gen: v7x
topology: tpu7x:2x2x1
jax: 0.10.0
libtpu: 0.0.40
codegen_flags: <defaults>
</compile_context>

<pallas_src>
import math
from functools import partial

import jax
import jax.numpy as jnp
from jax.experimental import pallas as pl
from jax.experimental.pallas import tpu as pltpu


def _round_up(x: int, m: int) -> int:
    return ((x + m - 1) // m) * m


def _physical_vmem_bytes() -> int:
    try:
        return int(pltpu.get_tpu_info().vmem_capacity_bytes)
    except Exception:
        return 64 << 20          # conservative (v7x per-TC VMEM)


def _build_step_maps(n_supports: int, max_step: int):
    """Per-step metadata for the Chebyshev recursion.

    Slot 0 holds x0; slot (t + 1) holds the output of computed step t.
    Reproduces the PyTorch `x1, x0 = (x2, x1)` carry-over exactly (including
    the carried x0 across supports).
    Returns lists: step->support, step->matmul-operand-slot,
                   step->subtract-slot, step->is-first-step-of-support.
    """
    s2sup, s2mm, s2sub, s2first = [], [], [], []
    x0_slot = 0
    x1_slot = 0
    for s in range(n_supports):
        t = len(s2sup)
        s2sup.append(s); s2mm.append(x0_slot); s2sub.append(0); s2first.append(1)
        x1_slot = t + 1
        for _k in range(2, max_step + 1):
            t = len(s2sup)
            s2sup.append(s); s2mm.append(x1_slot); s2sub.append(x0_slot); s2first.append(0)
            x0_slot = x1_slot          # x1, x0 = (x2, x1)
            x1_slot = t + 1
    return s2sup, s2mm, s2sub, s2first


def _choose_diffusion_tiling(n, num_metrics, d_pad, sup_bytes, budget):
    """Pick (tile_n, n_pad).  tile_n == n_pad means the support is resident."""
    def state_bytes(n_pad):
        # resident kernel output (num_metrics slots) + resident x0 input, f32
        return (num_metrics + 1) * n_pad * d_pad * 4

    # 1) fully-resident support (re-DMA'd only when the active support changes)
    n_pad = _round_up(n, 16)
    if state_bytes(n_pad) + 2 * n_pad * n_pad * sup_bytes <= budget:
        return n_pad, n_pad
    # 2) stream row blocks of the support; shrink the tile until it fits
    for tile_n in (256, 128, 64, 32, 16):
        n_pad = _round_up(n, tile_n)
        if state_bytes(n_pad) + 2 * tile_n * n_pad * sup_bytes <= budget:
            return tile_n, n_pad
    # 3) last resort: smallest tile.
    # TODO(synk): if the resident state itself exceeds the VMEM budget the
    # state would need to be tiled as well; not handled here.
    return 16, _round_up(n, 16)


def _diffusion_kernel(s2sup_ref, s2mm_ref, s2sub_ref, s2first_ref,
                      sup_ref, x0_ref, out_ref, *, tile_n):
    t = pl.program_id(0)          # Chebyshev step (sequential)
    r = pl.program_id(1)          # node row tile (sequential: shares resident state)

    # Slot 0 of the resident output holds x0 (written once, before any read).
    @pl.when((t == 0) & (r == 0))
    def _init():
        out_ref[0] = x0_ref[...]

    sup_tile = sup_ref[0]                              # [tile_n, n_pad], bf16
    mm_slot = s2mm_ref[t]
    sub_slot = s2sub_ref[t]
    is_first = s2first_ref[t]

    # Previous state (f32 resident) cast to the support dtype for the MXU;
    # accumulation stays f32.
    z_mm = out_ref[mm_slot].astype(sup_tile.dtype)     # [n_pad, d_pad]
    prod = jnp.dot(sup_tile, z_mm, preferred_element_type=jnp.float32)

    row0 = pl.multiple_of(r * tile_n, tile_n)

    # first step of a support: z = A @ x0
    @pl.when(is_first == 1)
    def _first():
        out_ref[t + 1, pl.ds(row0, tile_n), :] = prod

    # recursive step: z = 2 * (A @ x1) - x0
    @pl.when(is_first == 0)
    def _recur():
        z_sub = out_ref[sub_slot, pl.ds(row0, tile_n), :]
        out_ref[t + 1, pl.ds(row0, tile_n), :] = 2.0 * prod - z_sub


def _linear_kernel(x_ref, w_ref, b_ref, o_ref):
    o_ref[...] = (
        jnp.dot(x_ref[...], w_ref[...], preferred_element_type=jnp.float32) + b_ref[...]
    ).astype(o_ref.dtype)


def graph_conv_forward(inputs, supports, weight, bias, max_step,
                       supports_dtype=jnp.bfloat16):
    """
    inputs:   [B, N, input_dim] float32
    supports: [S, N, N] float32 (dense)
    weight:   [output_dim, input_dim * num_metrics]   (torch nn.Linear layout)
    bias:     [output_dim]
    returns:  [B, N, output_dim] float32
    """
    b, n, input_dim = inputs.shape
    s = supports.shape[0]
    num_metrics = max_step * s + 1
    d = input_dim * b
    f = input_dim * num_metrics
    out_dim = weight.shape[0]

    inputs = inputs.astype(jnp.float32)
    weight = weight.astype(jnp.float32)
    bias = bias.astype(jnp.float32)

    # x0 = inputs.permute(1, 2, 0).reshape(n, -1)  -> [N, input_dim * B]
    x0 = jnp.transpose(inputs, (1, 2, 0)).reshape(n, d)

    d_pad = max(128, _round_up(d, 128))              # lane-dense state
    phys_vmem = _physical_vmem_bytes()
    budget = max(phys_vmem - (8 << 20), 24 << 20)

    total_steps = s * max_step
    if total_steps == 0:
        n_pad = _round_up(n, 16)
        x0_pad = jnp.zeros((n_pad, d_pad), jnp.float32).at[:n, :d].set(x0)
        diff = x0_pad[None]                          # [1, N_pad, d_pad]
    else:
        sup_bytes = jnp.dtype(supports_dtype).itemsize
        tile_n, n_pad = _choose_diffusion_tiling(n, num_metrics, d_pad,
                                                 sup_bytes, budget)

        x0_pad = jnp.zeros((n_pad, d_pad), jnp.float32).at[:n, :d].set(x0)
        sup_pad = jnp.zeros((s, n_pad, n_pad), supports_dtype).at[:, :n, :n].set(
            supports.astype(supports_dtype))

        s2sup, s2mm, s2sub, s2first = _build_step_maps(s, max_step)
        s2sup = jnp.asarray(s2sup, jnp.int32)
        s2mm = jnp.asarray(s2mm, jnp.int32)
        s2sub = jnp.asarray(s2sub, jnp.int32)
        s2first = jnp.asarray(s2first, jnp.int32)

        n_row_tiles = n_pad // tile_n
        resident_support = (tile_n == n_pad)

        # Accurate VMEM accounting: resident out + resident x0 (single-buffered,
        # constant index maps) + double-buffered support block.
        state_bytes = (num_metrics + 1) * n_pad * d_pad * 4
        sup_buf_bytes = 2 * tile_n * n_pad * sup_bytes
        need = state_bytes + sup_buf_bytes
        vmem_limit = int(min(max(need + (4 << 20), 32 << 20), phys_vmem))

        sup_stream_bytes = (s if resident_support else total_steps) * n_pad * n_pad * sup_bytes
        diff_cost = pl.CostEstimate(
            flops=int(2 * total_steps * n_pad * n_pad * d_pad),
            transcendentals=0,
            bytes_accessed=int(sup_stream_bytes
                               + (num_metrics + 1) * n_pad * d_pad * 4),
        )

        diff = pl.pallas_call(
            partial(_diffusion_kernel, tile_n=tile_n),
            out_shape=jax.ShapeDtypeStruct((num_metrics, n_pad, d_pad), jnp.float32),
            grid_spec=pltpu.PrefetchScalarGridSpec(
                num_scalar_prefetch=4,
                grid=(total_steps, n_row_tiles),
                in_specs=[
                    # Support block: when resident (tile_n == n_pad) the block
                    # index only changes with su[t] -> one DMA per support
                    # chain; otherwise row blocks are streamed per grid step.
                    pl.BlockSpec((1, tile_n, n_pad),
                                 lambda t, r, su, mm, sb, fs: (su[t], r, 0)),
                    # x0 stays VMEM resident.
                    pl.BlockSpec((n_pad, d_pad),
                                 lambda t, r, su, mm, sb, fs: (0, 0)),
                ],
                # All Chebyshev states stay VMEM resident; written to HBM once.
                out_specs=pl.BlockSpec((num_metrics, n_pad, d_pad),
                                       lambda t, r, su, mm, sb, fs: (0, 0, 0)),
            ),
            compiler_params=pltpu.CompilerParams(
                # Both axes carry sequential deps through the resident state.
                dimension_semantics=("arbitrary", "arbitrary"),
                vmem_limit_bytes=vmem_limit,
            ),
            cost_estimate=diff_cost,
        )(s2sup, s2mm, s2sub, s2first, sup_pad, x0_pad)

    # ---- re-layout for the final Linear ------------------------------------
    # TODO(synk): small XLA transpose (see header comment).
    x = diff[:, :n, :d].reshape(num_metrics, n, input_dim, b)
    x = jnp.transpose(x, (3, 1, 2, 0)).reshape(b * n, f)

    # ---- row-tiled Linear, lane-dense (128-padded) output -------------------
    m_rows = b * n
    tile_m = _round_up(m_rows, 8) if m_rows <= 2048 else 2048
    m_pad = _round_up(m_rows, tile_m)
    if m_pad != m_rows:
        x = jnp.zeros((m_pad, f), jnp.float32).at[:m_rows, :].set(x)

    o_pad = max(128, _round_up(out_dim, 128))
    w_t = jnp.zeros((f, o_pad), jnp.float32).at[:, :out_dim].set(weight.T)
    bias_row = jnp.zeros((1, o_pad), jnp.float32).at[0, :out_dim].set(bias)

    lin_need = (2 * tile_m * f * 4 + 2 * f * o_pad * 4
                + 2 * o_pad * 4 + 2 * tile_m * o_pad * 4)
    lin_vmem = int(min(max(lin_need + (4 << 20), 32 << 20), phys_vmem))

    lin_cost = pl.CostEstimate(
        flops=int(2 * m_pad * f * o_pad),
        transcendentals=0,
        bytes_accessed=int(4 * (m_pad * f + f * o_pad + m_pad * o_pad)),
    )

    out = pl.pallas_call(
        _linear_kernel,
        out_shape=jax.ShapeDtypeStruct((m_pad, o_pad), jnp.float32),
        grid_spec=pltpu.PrefetchScalarGridSpec(
            num_scalar_prefetch=0,
            grid=(m_pad // tile_m,),
            in_specs=[
                pl.BlockSpec((tile_m, f), lambda i: (i, 0)),
                pl.BlockSpec((f, o_pad), lambda i: (0, 0)),
                pl.BlockSpec((1, o_pad), lambda i: (0, 0)),
            ],
            out_specs=pl.BlockSpec((tile_m, o_pad), lambda i: (i, 0)),
        ),
        compiler_params=pltpu.CompilerParams(
            dimension_semantics=("parallel",),
            vmem_limit_bytes=lin_vmem,
        ),
        cost_estimate=lin_cost,
    )(x, w_t, bias_row)

    return out[:m_rows, :out_dim].reshape(b, n, out_dim)


def _reference_forward(inputs, supports, weight, bias, max_step):
    """Plain-JAX (f32) mirror of the PyTorch forward (for verification)."""
    b, n, input_dim = inputs.shape
    x0 = jnp.transpose(inputs, (1, 2, 0)).reshape(n, -1)
    xs = [x0]
    x0c = x0
    for si in range(supports.shape[0]):
        sup = supports[si]
        x1 = sup @ x0c
        xs.append(x1)
        for _ in range(2, max_step + 1):
            x2 = 2.0 * (sup @ x1) - x0c
            xs.append(x2)
            x1, x0c = x2, x1
    x = jnp.stack(xs, axis=0)
    m = x.shape[0]
    x = x.reshape(m, n, input_dim, b)
    x = jnp.transpose(x, (3, 1, 2, 0)).reshape(b, n, -1)
    return x @ weight.T + bias


if __name__ == "__main__":
    # Small shapes consistent with the module's forward.
    B, N, INPUT_DIM, OUTPUT_DIM = 2, 16, 4, 8
    N_SUPPORTS, MAX_STEP = 2, 2
    NUM_METRICS = MAX_STEP * N_SUPPORTS + 1
    F_IN = INPUT_DIM * NUM_METRICS

    key = jax.random.PRNGKey(0)
    k_in, k_sup, k_w, k_b = jax.random.split(key, 4)

    inputs = jax.random.normal(k_in, (B, N, INPUT_DIM), dtype=jnp.float32)
    supports = jax.random.normal(k_sup, (N_SUPPORTS, N, N), dtype=jnp.float32) * 0.1

    # nn.Linear(F_IN, OUTPUT_DIM) init (uniform bound, deterministic).
    bound = 1.0 / math.sqrt(F_IN)
    weight = jax.random.uniform(
        k_w, (OUTPUT_DIM, F_IN), minval=-bound, maxval=bound, dtype=jnp.float32
    )
    bias = jax.random.uniform(
        k_b, (OUTPUT_DIM,), minval=-bound, maxval=bound, dtype=jnp.float32
    )

    fwd = jax.jit(graph_conv_forward, static_argnums=(4,))
    out = fwd(inputs, supports, weight, bias, MAX_STEP)
    out = jax.block_until_ready(out)

    ref = _reference_forward(inputs, supports, weight, bias, MAX_STEP)
    assert out.shape == (B, N, OUTPUT_DIM)
    # bf16 supports / MXU operands vs. the pure-f32 reference -> loose tolerance.
    assert jnp.allclose(out, ref, atol=2e-2, rtol=2e-2), "mismatch vs reference"

    print("KERNEL_OK")
</pallas_src>

<mosaic_0001>
module attributes {stable_mosaic.version = 11 : i64} {
  func.func @_diffusion_kernel(%arg0: i32, %arg1: i32, %arg2: memref<4xi32, #tpu.memory_space<smem>>, %arg3: memref<4xi32, #tpu.memory_space<smem>>, %arg4: memref<4xi32, #tpu.memory_space<smem>>, %arg5: memref<4xi32, #tpu.memory_space<smem>>, %arg6: memref<1x16x16xbf16, #tpu.memory_space<vmem>>, %arg7: memref<16x128xf32, #tpu.memory_space<vmem>>, %arg8: memref<5x16x128xf32, #tpu.memory_space<vmem>>) attributes {dimension_semantics = [#tpu.dimension_semantics<arbitrary>, #tpu.dimension_semantics<arbitrary>], iteration_bounds = array<i64: 4, 1>, scalar_prefetch = 4 : i64, scratch_operands = 0 : i64, tpu.core_type = #tpu.core_type<tc>, window_params = [{transform_indices = @transform_0, window_bounds = array<i64: 1, 16, 16>}, {pipeline_mode = #tpu.pipeline_mode<synchronous>, transform_indices = @transform_1, window_bounds = array<i64: 16, 128>}, {pipeline_mode = #tpu.pipeline_mode<synchronous>, transform_indices = @transform_2, window_bounds = array<i64: 5, 16, 128>}]} {
    %c0_i32 = arith.constant 0 : i32
    %0 = arith.cmpi eq, %arg0, %c0_i32 : i32
    %c0_i32_0 = arith.constant 0 : i32
    %1 = arith.cmpi eq, %arg1, %c0_i32_0 : i32
    %2 = arith.andi %0, %1 : i1
    %3 = arith.extui %2 : i1 to i32
    %c0_i32_1 = arith.constant 0 : i32
    %4 = arith.cmpi ne, %3, %c0_i32_1 : i32
    scf.if %4 {
      %c0_9 = arith.constant 0 : index
      %c0_10 = arith.constant 0 : index
      %26 = vector.load %arg7[%c0_9, %c0_10] : memref<16x128xf32, #tpu.memory_space<vmem>>, vector<16x128xf32>
      %c0_11 = arith.constant 0 : index
      %c0_12 = arith.constant 0 : index
      %c0_13 = arith.constant 0 : index
      %27 = vector.load %arg8[%c0_11, %c0_12, %c0_13] : memref<5x16x128xf32, #tpu.memory_space<vmem>>, vector<1x16x128xf32>
      %28 = vector.shape_cast %27 : vector<1x16x128xf32> to vector<16x128xf32>
      %29 = vector.shape_cast %26 : vector<16x128xf32> to vector<1x16x128xf32>
      tpu.vector_store %arg8[%c0_11, %c0_12, %c0_13], %29 {strides = array<i32>} : memref<5x16x128xf32, #tpu.memory_space<vmem>>, vector<1x16x128xf32>,
    } else {
    }
    %c0 = arith.constant 0 : index
    %c0_2 = arith.constant 0 : index
    %c0_3 = arith.constant 0 : index
    %5 = vector.load %arg6[%c0, %c0_2, %c0_3] : memref<1x16x16xbf16, #tpu.memory_space<vmem>>, vector<1x16x16xbf16>
    %6 = vector.shape_cast %5 : vector<1x16x16xbf16> to vector<16x16xbf16>
    %7 = arith.index_cast %arg0 : i32 to index
    %8 = memref.load %arg3[%7] : memref<4xi32, #tpu.memory_space<smem>>
    %9 = arith.index_cast %arg0 : i32 to index
    %10 = memref.load %arg4[%9] : memref<4xi32, #tpu.memory_space<smem>>
    %11 = arith.index_cast %arg0 : i32 to index
    %12 = memref.load %arg5[%11] : memref<4xi32, #tpu.memory_space<smem>>
    %13 = arith.index_cast %8 : i32 to index
    %c0_4 = arith.constant 0 : index
    %c0_5 = arith.constant 0 : index
    %14 = vector.load %arg8[%13, %c0_4, %c0_5] : memref<5x16x128xf32, #tpu.memory_space<vmem>>, vector<1x16x128xf32>
    %15 = vector.shape_cast %14 : vector<1x16x128xf32> to vector<16x128xf32>
    %16 = arith.truncf %15 : vector<16x128xf32> to vector<16x128xbf16>
    %cst = arith.constant dense<0.000000e+00> : vector<16x128xf32>
    %17 = tpu.matmul %6, %16, %cst {dimension_numbers = #tpu.dot_dimension_numbers<[1], [0], [0], [1], [0, 0, 1, 1], [], []>} : vector<16x16xbf16>, vector<16x128xbf16>, vector<16x128xf32> -> vector<16x128xf32>
    %c16_i32 = arith.constant 16 : i32
    %18 = arith.muli %arg1, %c16_i32 : i32
    %19 = tpu.assume_multiple %18, 16 : i32
    %c1_i32 = arith.constant 1 : i32
    %20 = arith.cmpi eq, %12, %c1_i32 : i32
    %21 = arith.extui %20 : i1 to i32
    %c0_i32_6 = arith.constant 0 : i32
    %22 = arith.cmpi ne, %21, %c0_i32_6 : i32
    scf.if %22 {
      %c1_i32_9 = arith.constant 1 : i32
      %26 = arith.addi %arg0, %c1_i32_9 : i32
      %27 = arith.index_cast %26 : i32 to index
      %28 = arith.index_cast %19 : i32 to index
      %c0_10 = arith.constant 0 : index
      %29 = vector.load %arg8[%27, %28, %c0_10] : memref<5x16x128xf32, #tpu.memory_space<vmem>>, vector<1x16x128xf32>
      %30 = vector.shape_cast %29 : vector<1x16x128xf32> to vector<16x128xf32>
      %31 = vector.shape_cast %17 : vector<16x128xf32> to vector<1x16x128xf32>
      tpu.vector_store %arg8[%27, %28, %c0_10], %31 {strides = array<i32>} : memref<5x16x128xf32, #tpu.memory_space<vmem>>, vector<1x16x128xf32>,
    } else {
    }
    %c0_i32_7 = arith.constant 0 : i32
    %23 = arith.cmpi eq, %12, %c0_i32_7 : i32
    %24 = arith.extui %23 : i1 to i32
    %c0_i32_8 = arith.constant 0 : i32
    %25 = arith.cmpi ne, %24, %c0_i32_8 : i32
    scf.if %25 {
      %26 = arith.index_cast %10 : i32 to index
      %27 = arith.index_cast %19 : i32 to index
      %c0_9 = arith.constant 0 : index
      %28 = vector.load %arg8[%26, %27, %c0_9] : memref<5x16x128xf32, #tpu.memory_space<vmem>>, vector<1x16x128xf32>
      %29 = vector.shape_cast %28 : vector<1x16x128xf32> to vector<16x128xf32>
      %cst_10 = arith.constant 2.000000e+00 : f32
      %30 = vector.broadcast %cst_10 : f32 to vector<16x128xf32>
      %31 = arith.mulf %30, %17 : vector<16x128xf32>
      %32 = arith.subf %31, %29 : vector<16x128xf32>
      %c1_i32_11 = arith.constant 1 : i32
      %33 = arith.addi %arg0, %c1_i32_11 : i32
      %34 = arith.index_cast %33 : i32 to index
      %35 = arith.index_cast %19 : i32 to index
      %c0_12 = arith.constant 0 : index
      %36 = vector.load %arg8[%34, %35, %c0_12] : memref<5x16x128xf32, #tpu.memory_space<vmem>>, vector<1x16x128xf32>
      %37 = vector.shape_cast %36 : vector<1x16x128xf32> to vector<16x128xf32>
      %38 = vector.shape_cast %32 : vector<16x128xf32> to vector<1x16x128xf32>
      tpu.vector_store %arg8[%34, %35, %c0_12], %38 {strides = array<i32>} : memref<5x16x128xf32, #tpu.memory_space<vmem>>, vector<1x16x128xf32>,
    } else {
    }
    return
  }
  func.func @transform_0(%arg0: i32, %arg1: i32, %arg2: memref<4xi32, #tpu.memory_space<smem>>, %arg3: memref<4xi32, #tpu.memory_space<smem>>, %arg4: memref<4xi32, #tpu.memory_space<smem>>, %arg5: memref<4xi32, #tpu.memory_space<smem>>) -> (i32, i32, i32) {
    %0 = arith.index_cast %arg0 : i32 to index
    %1 = memref.load %arg2[%0] : memref<4xi32, #tpu.memory_space<smem>>
    %c0_i32 = arith.constant 0 : i32
    %c0_i32_0 = arith.constant 0 : i32
    return %1, %arg1, %c0_i32 : i32, i32, i32
  }
  func.func @transform_1(%arg0: i32, %arg1: i32, %arg2: memref<4xi32, #tpu.memory_space<smem>>, %arg3: memref<4xi32, #tpu.memory_space<smem>>, %arg4: memref<4xi32, #tpu.memory_space<smem>>, %arg5: memref<4xi32, #tpu.memory_space<smem>>) -> (i32, i32) {
    %c0_i32 = arith.constant 0 : i32
    %c0_i32_0 = arith.constant 0 : i32
    %c0_i32_1 = arith.constant 0 : i32
    return %c0_i32, %c0_i32_0 : i32, i32
  }
  func.func @transform_2(%arg0: i32, %arg1: i32, %arg2: memref<4xi32, #tpu.memory_space<smem>>, %arg3: memref<4xi32, #tpu.memory_space<smem>>, %arg4: memref<4xi32, #tpu.memory_space<smem>>, %arg5: memref<4xi32, #tpu.memory_space<smem>>) -> (i32, i32, i32) {
    %c0_i32 = arith.constant 0 : i32
    %c0_i32_0 = arith.constant 0 : i32
    %c0_i32_1 = arith.constant 0 : i32
    %c0_i32_2 = arith.constant 0 : i32
    return %c0_i32, %c0_i32_0, %c0_i32_1 : i32, i32, i32
  }
}

module attributes {stable_mosaic.version = 11 : i64} {
  func.func @_linear_kernel(%arg0: i32, %arg1: memref<32x20xf32, #tpu.memory_space<vmem>>, %arg2: memref<20x128xf32, #tpu.memory_space<vmem>>, %arg3: memref<1x128xf32, #tpu.memory_space<vmem>>, %arg4: memref<32x128xf32, #tpu.memory_space<vmem>>) attributes {dimension_semantics = [#tpu.dimension_semantics<parallel>], iteration_bounds = array<i64: 1>, scalar_prefetch = 0 : i64, scratch_operands = 0 : i64, tpu.core_type = #tpu.core_type<tc>, window_params = [{transform_indices = @transform_0, window_bounds = array<i64: 32, 20>}, {pipeline_mode = #tpu.pipeline_mode<synchronous>, transform_indices = @transform_1, window_bounds = array<i64: 20, 128>}, {pipeline_mode = #tpu.pipeline_mode<synchronous>, transform_indices = @transform_2, window_bounds = array<i64: 1, 128>}, {transform_indices = @transform_3, window_bounds = array<i64: 32, 128>}]} {
    %c0 = arith.constant 0 : index
    %c0_0 = arith.constant 0 : index
    %0 = vector.load %arg1[%c0, %c0_0] : memref<32x20xf32, #tpu.memory_space<vmem>>, vector<32x20xf32>
    %c0_1 = arith.constant 0 : index
    %c0_2 = arith.constant 0 : index
    %1 = vector.load %arg2[%c0_1, %c0_2] : memref<20x128xf32, #tpu.memory_space<vmem>>, vector<20x128xf32>
    %cst = arith.constant dense<0.000000e+00> : vector<32x128xf32>
    %2 = tpu.matmul %0, %1, %cst {dimension_numbers = #tpu.dot_dimension_numbers<[1], [0], [0], [1], [0, 0, 1, 1], [], []>} : vector<32x20xf32>, vector<20x128xf32>, vector<32x128xf32> -> vector<32x128xf32>
    %c0_3 = arith.constant 0 : index
    %c0_4 = arith.constant 0 : index
    %3 = vector.load %arg3[%c0_3, %c0_4] : memref<1x128xf32, #tpu.memory_space<vmem>>, vector<1x128xf32>
    %4 = vector.broadcast %3 : vector<1x128xf32> to vector<32x128xf32>
    %5 = arith.addf %2, %4 : vector<32x128xf32>
    %c0_5 = arith.constant 0 : index
    %c0_6 = arith.constant 0 : index
    %6 = vector.load %arg4[%c0_5, %c0_6] : memref<32x128xf32, #tpu.memory_space<vmem>>, vector<32x128xf32>
    tpu.vector_store %arg4[%c0_5, %c0_6], %5 {strides = array<i32>} : memref<32x128xf32, #tpu.memory_space<vmem>>, vector<32x128xf32>,
    return
  }
  func.func @transform_0(%arg0: i32) -> (i32, i32) {
    %c0_i32 = arith.constant 0 : i32
    %c0_i32_0 = arith.constant 0 : i32
    return %arg0, %c0_i32 : i32, i32
  }
  func.func @transform_1(%arg0: i32) -> (i32, i32) {
    %c0_i32 = arith.constant 0 : i32
    %c0_i32_0 = arith.constant 0 : i32
    %c0_i32_1 = arith.constant 0 : i32
    return %c0_i32, %c0_i32_0 : i32, i32
  }
  func.func @transform_2(%arg0: i32) -> (i32, i32) {
    %c0_i32 = arith.constant 0 : i32
    %c0_i32_0 = arith.constant 0 : i32
    %c0_i32_1 = arith.constant 0 : i32
    return %c0_i32, %c0_i32_0 : i32, i32
  }
  func.func @transform_3(%arg0: i32) -> (i32, i32) {
    %c0_i32 = arith.constant 0 : i32
    %c0_i32_0 = arith.constant 0 : i32
    return %arg0, %c0_i32 : i32, i32
  }
}

</mosaic_0001>

<bundles_post_ra>
// kernel: graph_conv_forward.2
= control target key start
LH: loop header
LB: loop body
LE: loop exit
PB: predicated region body
PF: predicated region fallthrough
CT: control target
= control target key end

     0   :  { %s600_s0 = inlined_call_operand.vmem [shape: s32[4], index: 0, kind: input, shape index: {}]   ;;  %s601_s4 = inlined_call_operand.vmem [shape: bf16[2,16,16], index: 4, kind: input, shape index: {}]   ;;  %s602_s5 = inlined_call_operand.vmem [shape: f32[16,128], index: 5, kind: input, shape index: {}]   ;;  %s603_s6 = inlined_call_operand.vmem [shape: f32[5,16,128], index: 6, kind: output, shape index: {}]   ;;  %s604_s1 = inlined_call_operand.vmem [shape: s32[4], index: 1, kind: input, shape index: {}]   ;;  %s605_s2 = inlined_call_operand.vmem [shape: s32[4], index: 2, kind: input, shape index: {}]   ;;  %s606_s3 = inlined_call_operand.vmem [shape: s32[4], index: 3, kind: input, shape index: {}]  }
   0x1   :  { %s11_s23 = sshll.u32 %s600_s0, 4  ;;  %s15_s26 = sshll.u32 %s604_s1, 4  ;;  %s12_s23 = int_to_ptr.vmem [resolvable:$true] %s11_s23  ;;  %s16_s26 = int_to_ptr.vmem [resolvable:$true] %s15_s26 }
   0x2   :  { %s407_s27 = scalar_lea.vmem %s12_s23, 16  ;;  %p412_p1 = scmp.lt.s32.totalorder %s12_s23, %s12_s23 }
   0x3   :  { %p408_p0 = scmp.ne.s32.totalorder %s12_s23, %s407_s27  ;;  %p413_p2 = scmp.lt.s32.totalorder %s407_s27, %s407_s27 }
   0x5   :  { %p414_p3 = por %p413_p2, %p412_p1 }
   0x7   :  { %p415_p4 = pnand %p414_p3, %p408_p0 }
   0x9   :  { %418 = shalt.err (!%p415_p4)  }
   0xa   :  { %s481_s28 = smov [#allocation3]   ;;  %s419_s29 = scalar_lea.vmem %s16_s26, 16 }
   0xb   :  { %14 = dma.vmem_to_smem %s12_s23, 16, %s481_s28, [#allocation2] }
   0xc   :  { %p420_p5 = scmp.ne.s32.totalorder %s16_s26, %s419_s29  ;;  %p424_p6 = scmp.lt.s32.totalorder %s16_s26, %s16_s26 }
   0xd   :  { %p425_p7 = scmp.lt.s32.totalorder %s419_s29, %s419_s29 }
   0xf   :  { %p426_p8 = por %p425_p7, %p424_p6 }
  0x11   :  { %p427_p9 = pnand %p426_p8, %p420_p5 }
  0x13   :  { %430 = shalt.err (!%p427_p9)  }
  0x14   :  { %s482_s0 = smov [#allocation4]   ;;  %s19_s7 = sshll.u32 %s605_s2, 4  ;;  %s20_s7 = int_to_ptr.vmem [resolvable:$true] %s19_s7 }
  0x15   :  { %18 = dma.vmem_to_smem %s16_s26, 16, %s482_s0, [#allocation2] }
  0x16   :  { %s23_s10 = sshll.u32 %s606_s3, 4  ;;  %s431_s11 = scalar_lea.vmem %s20_s7, 16  ;;  %s24_s10 = int_to_ptr.vmem [resolvable:$true] %s23_s10 }
  0x17   :  { %p432_p10 = scmp.ne.s32.totalorder %s20_s7, %s431_s11  ;;  %p436_p11 = scmp.lt.s32.totalorder %s20_s7, %s20_s7 }
  0x18   :  { %p437_p12 = scmp.lt.s32.totalorder %s431_s11, %s431_s11 }
  0x1a   :  { %p438_p13 = por %p437_p12, %p436_p11 }
  0x1c   :  { %p439_p0 = pnand %p438_p13, %p432_p10 }
  0x1e   :  { %442 = shalt.err (!%p439_p0)  }
  0x1f   :  { %s483_s12 = smov [#allocation5]   ;;  %s443_s13 = scalar_lea.vmem %s24_s10, 16 }
  0x20   :  { %22 = dma.vmem_to_smem %s20_s7, 16, %s483_s12, [#allocation2] }
  0x21   :  { %p444_p1 = scmp.ne.s32.totalorder %s24_s10, %s443_s13  ;;  %p448_p2 = scmp.lt.s32.totalorder %s24_s10, %s24_s10 }
  0x22   :  { %p449_p3 = scmp.lt.s32.totalorder %s443_s13, %s443_s13 }
  0x24   :  { %p450_p4 = por %p449_p3, %p448_p2 }
  0x26   :  { %p451_p5 = pnand %p450_p4, %p444_p1 }
  0x28   :  { %454 = shalt.err (!%p451_p5)  }
  0x29   :  { %s484_s2 = smov [#allocation6]  }
  0x2a   :  { %26 = dma.vmem_to_smem %s24_s10, 16, %s484_s2, [#allocation2] }
  0x2b   :  { %467 = dma.done.wait [#allocation2], 64 }
  0x2c   :  { %468 = vsyncadd [#allocation2], 4294967232 }
  0x2d   :  { %28 = sfence }
  0x2e   :  { %s534_s3 = smov 0   ;;  %s536_s14 = smov 0  }
  0x2f   :  { %s538_s15 = smov 0  }
  0x30 LB: > { %s46_s16 = sadd.s32 1, %s475_s14  ;;  %p348_p6 = scmp.ge.s32.totalorder %s479_s15, 1  ;;  %s479_s15 = sphi %s538_s15, %s34_s15   ;;  %s475_s14 = sphi %s536_s14, %s608_s14   ;;  %s471_s3 = sphi %s534_s3, %s607_s3  }
  0x31   : > { %p48_p7 = scmp.ge.s32.totalorder %s46_s16, 4  ;;  %p152_p8 = scmp.lt.s32.totalorder %s479_s15, 5 }
  0x33   : > { %s610_s16 = smov (%p48_p7, %s46_s16), 0  ;;  %p153_p9 = pnand %p348_p6, %p152_p8 }
  0x34   : > { %s174_s17 = sld [smem:[#allocation3 + %s471_s3]] (!%p153_p9)  ;;  %p187_p10 = scmp.eq.s32.totalorder (!%p153_p9), %s471_s3, 0 }
  0x35   : > { %156 = sbr.rel (%p153_p9) target bundleno = 308 (0x134), region = 28 }
  0x3a   : > { %p176_p11 = scmp.lt.s32.totalorder (!%p153_p9), %s174_s17, 1 }
  0x3c   : > { %s612_s17 = smov (!%p176_p11, %s174_s17), 1  ;;  %192 = sbr.rel (!%p187_p10) target bundleno = 67 (0x43), region = 32 }
  0x3d   : > { %s366_s18 = sshll.u32 %s612_s17, 3  ;;  %v193_v0 = vld [vmem:[%s602_s5] sm:$0xff] (%p187_p10)  ;;  %v194_v1 = vld [vmem:[%s602_s5 + $0x8] sm:$0xff] (%p187_p10) }
  0x3e   : > { %s183_s21 = scalar_lea.vmem %s601_s4, %s366_s18  ;;  %195 = vst [vmem:[%s603_s6] sm:$0xff] (%p187_p10), %v193_v0  ;;  %196 = vst [vmem:[%s603_s6 + $0x8] sm:$0xff] (%p187_p10), %v194_v1 }
  0x43 PF: > { %s572_s0 = sld [smem:[#allocation5 + %s471_s3]]  ;;  %v485_v2 = vmov 0.0   ;;  %vm486_vm0 = vmmov 0   ;;  %v406_v6 = vld [vmem:[%s183_s21] sm:$0xff]   ;;  %vm212_vm1 = vcmask 130048  }
  0x44   : > { %s201_s1 = sld [smem:[#allocation6 + %s471_s3]]  ;;  %370 = vmatprep.subr.bf16.mxu0 %v485_v2  ;;  %372 = vmatprep.mubr.msk.bf16.mxu0 %vm486_vm0, %v485_v2 }
  0x45   : > { %s199_s30 = sld [smem:[#allocation4 + %s471_s3]] }
  0x4a   : > { %p355_p12 = scmp.ne.s32.totalorder %s201_s1, 1 }
  0x4b   : > { %s352_s7 = sshll.u32 %s199_s30, 4  ;;  %s356_s11 = sshll.u32 (!%p355_p12), %s471_s3, 4 }
  0x4c   : > { %s203_s10 = scalar_lea.vmem %s603_s6, %s352_s7  ;;  %s315_s2 = scalar_lea.vmem (!%p355_p12), %s603_s6, %s356_s11 }
  0x4d   : > { %v204_v3 = vld [vmem:[%s203_s10] sm:$0xff]  ;;  %v205_v4 = vld [vmem:[%s203_s10 + $0x8] sm:$0xff] }
  0x4e   : > { %v206_v5 = vpack.c.bf16 %v205_v4, %v204_v3 }
  0x50   : > { %371 = vmatpush3.bf16.msra.mxu0 %v206_v5 }
  0x53   : > { %373 = vmatmul.mubr.msk.bf16.vlgmr.msra.gmra.mrb[0].mxu0 %vm212_vm1, %v406_v6 }
 0x123   : > { %261 = sbr.rel (%p355_p12) target bundleno = 298 (0x12a), region = 36 }
 0x126   : > { %v250_v7 = vpop.f32.mrb[0].mxu0 }
 0x127   : > { %v374_v8 = vpop.f32.mrb[1].mxu0  ;;  %357 = vst [vmem:[%s315_s2 + $0x10] sm:$0xff] (!%p355_p12), %v250_v7 }
 0x128   : > { %v253_v9 = vpop.f32.mrb[2].mxu0 }
 0x129   : > { %v375_v10 = vpop.f32.mrb[3].mxu0  ;;  %358 = vst [vmem:[%s315_s2 + $0x18] sm:$0xff] (!%p355_p12), %v253_v9 }
 0x12a PF: > { %p359_p13 = scmp.ne.s32.totalorder %s201_s1, 0 }
 0x12b   : > { %s360_s17 = sshll.u32 (!%p359_p13), %s572_s0, 4  ;;  %v277_v11 = vmul.f32 (!%p359_p13), 2.0, %v250_v7  ;;  %v278_v12 = vmul.f32 (!%p359_p13), 2.0, %v253_v9  ;;  %s361_s18 = sshll.u32 (!%p359_p13), %s471_s3, 4 }
 0x12c   : > { %271 = sbr.rel (%p359_p13) target bundleno = 308 (0x134), region = 40  ;;  %s274_s21 = scalar_lea.vmem (!%p359_p13), %s603_s6, %s360_s17 }
 0x12d   : > { %s324_s24 = scalar_lea.vmem (!%p359_p13), %s603_s6, %s361_s18 }
 0x130   : > { %v275_v13 = vld [vmem:[%s274_s21] sm:$0xff] (!%p359_p13)  ;;  %v276_v14 = vld [vmem:[%s274_s21 + $0x8] sm:$0xff] (!%p359_p13) }
 0x131   : > { %v279_v15 = vsub.f32 (!%p359_p13), %v277_v11, %v275_v13  ;;  %v280_v16 = vsub.f32 (!%p359_p13), %v278_v12, %v276_v14 }
 0x133   : > { %362 = vst [vmem:[%s324_s24 + $0x10] sm:$0xff] %v279_v15  ;;  %363 = vst [vmem:[%s324_s24 + $0x18] sm:$0xff] %v280_v16 }
 0x134 PF: > { %s34_s15 = sadd.s32 1, %s479_s15   ;;  %s607_s3 = smov %s475_s14 }
 0x135   : > { %p31_p0 = scmp.ge.s32.totalorder %s34_s15, 6   ;;  %s608_s14 = smov %s610_s16 }
 0x137   :  { %33 = sbr.rel (!%p31_p0) target bundleno = 48 (0x30), region = 70 }

// kernel: graph_conv_forward.3
= control target key start
LH: loop header
LB: loop body
LE: loop exit
PB: predicated region body
PF: predicated region fallthrough
CT: control target
= control target key end

     0   :  { %vm28_vm0 = vcmask 162816   ;;  %vm41_vm1 = vcmask 1043456   ;;  %s231_s1 = inlined_call_operand.vmem [shape: f32[20,128], index: 1, kind: input, shape index: {}]   ;;  %s232_s0 = inlined_call_operand.vmem [shape: f32[32,20], index: 0, kind: input, shape index: {}]   ;;  %s233_s2 = inlined_call_operand.vmem [shape: f32[1,128], index: 2, kind: input, shape index: {}]   ;;  %s234_s3 = inlined_call_operand.vmem [shape: f32[32,128], index: 3, kind: output, shape index: {}]  }
   0x1   :  { %v18_v0 = vld [vmem:[%s231_s1] sm:$0xff]  ;;  %v19_v1 = vld [vmem:[%s231_s1 + $0x8] sm:$0xff]  ;;  %v16_v4 = vld [vmem:[%s232_s0 + $0x10] sm:$0xff] }
   0x2   :  { %v163_v2 = vpack.c.bf16 %v19_v1, %v18_v0  ;;  %v14_v3 = vld [vmem:[%s232_s0] sm:$0xff]  ;;  %v20_v5 = vld [vmem:[%s231_s1 + $0x10] sm:$0xf]  ;;  %160 = vmatprep.mubr.msk.f32.mxu1 %vm28_vm0, %v16_v4  ;;  %v15_v6 = vld [vmem:[%s232_s0 + $0x8] sm:$0xff] }
   0x3   :  { %157 = vmatprep.mubr.msk.f32.mxu0 %vm28_vm0, %v14_v3  ;;  %v17_v7 = vld [vmem:[%s232_s0 + $0x18] sm:$0xff]  ;;  %v138_v8 = vld [vmem:[%s233_s2] ss:$0 sm:$0xff] }
   0x4   :  { %164 = vmatprep.subr.bf16.mxu0 %v163_v2  ;;  %167 = vmatprep.subr.bf16.mxu1 %v163_v2 }
   0x5   :  { %166 = vmatpush3.bf16.msra.mxu0 %v163_v2  ;;  %169 = vmatpush3.bf16.msra.mxu1 %v163_v2 }
   0x6   :  { %155 = vmatprep.subr.msk.mxu0 %vm41_vm1, %v20_v5  ;;  %168 = vmatprep.subr.msk.mxu1 %vm41_vm1, %v20_v5 }
   0x9   :  { %156 = vmatpush3.msk.msra.mxu0 %vm41_vm1, %v20_v5  ;;  %170 = vmatpush3.msk.msra.mxu1 %vm41_vm1, %v20_v5 }
   0xa   :  { %158 = vmatmul.mubr.msk.f32.vlgmr.msra.gmra.mrb[0].mxu0 %vm28_vm0, %v15_v6  ;;  %161 = vmatmul.mubr.msk.f32.vlgmr.msra.gmra.mrb[0].mxu1 %vm28_vm0, %v17_v7 }
  0xdd   :  { %v159_v9 = vpop.f32.mrb[0].mxu0  ;;  %v162_v10 = vpop.f32.mrb[0].mxu1 }
  0xde   :  { %v117_v11 = vadd.f32 %v159_v9, %v138_v8  ;;  %v127_v12 = vadd.f32 %v162_v10, %v138_v8  ;;  %v111_v13 = vpop.f32.mrb[1].mxu0  ;;  %v121_v14 = vpop.f32.mrb[1].mxu1 }
  0xdf   :  { %v112_v15 = vadd.f32 %v138_v8, %v111_v13  ;;  %v122_v16 = vadd.f32 %v138_v8, %v121_v14 }
  0xe0   :  { %131 = vst [vmem:[%s234_s3 + $0x8] sm:$0xff] %v117_v11  ;;  %133 = vst [vmem:[%s234_s3 + $0x18] sm:$0xff] %v127_v12 }
  0xe1   :  { %130 = vst [vmem:[%s234_s3] sm:$0xff] %v112_v15  ;;  %132 = vst [vmem:[%s234_s3 + $0x10] sm:$0xff] %v122_v16 }

</bundles_post_ra>
